<compile_context>
chip_gen: v7x
topology: tpu7x:2x2x1
jax: 0.10.0
libtpu: 0.0.40
codegen_flags: <defaults>
</compile_context>

<pallas_src>
import math

import jax
import jax.numpy as jnp
from jax import lax
from jax.experimental import pallas as pl
from jax.experimental.pallas import tpu as pltpu


def _round_up(x, m):
    return (x + m - 1) // m * m


def _pick_tile(n, pref, align):
    """Largest multiple of `align` <= pref that divides n (n must be aligned)."""
    if n <= pref:
        return n
    t = (pref // align) * align
    while n % t:
        t -= align
    return t


def _buf_bytes(rows, cols, dtype):
    """Rough VMEM footprint of a (rows, cols) buffer after lane/sublane padding."""
    return _round_up(rows, 8) * _round_up(cols, 128) * jnp.dtype(dtype).itemsize


def _make_kernel(has_kpm: bool, has_attn: bool):
    """Ref order: q, k, M, v, [kpm], [attn], out, qm_scratch, qv_scratch."""

    def kernel(*refs):
        q_ref, k_ref, m_ref, v_ref = refs[:4]
        idx = 4
        kpm_ref = None
        attn_ref = None
        if has_kpm:
            kpm_ref = refs[idx]
            idx += 1
        if has_attn:
            attn_ref = refs[idx]
            idx += 1
        out_ref = refs[idx]
        qm_ref = refs[idx + 1]
        qv_ref = refs[idx + 2]

        # Hoisted fused projection: computed once per (b, qi) tile (ki == 0),
        # then reused for every key tile (grid axis 2 is "arbitrary"/sequential).
        @pl.when(pl.program_id(2) == 0)
        def _():
            q = q_ref[0]                                           # (tq, Dq)
            qm_ref[...] = jnp.dot(
                q, m_ref[...], preferred_element_type=jnp.float32
            ).astype(qm_ref.dtype)                                 # (tq, Dk)
            qv_ref[...] = jnp.dot(
                q, v_ref[...], preferred_element_type=jnp.float32)  # (tq, 1)

        k = k_ref[0]                                               # (tk, Dk)
        logits = lax.dot_general(                                  # (tq, tk), NT
            qm_ref[...], k, (((1,), (1,)), ((), ())),
            preferred_element_type=jnp.float32)
        logits = logits + qv_ref[...]                              # (tq,1) bcast

        if has_attn:
            mask = attn_ref[0].astype(jnp.float32)                 # (tq, tk)
            if has_kpm:
                mask = mask * kpm_ref[0].astype(jnp.float32)       # (1, tk) bcast
            logits = logits + (1.0 - mask) * (-1.0e9)
        elif has_kpm:
            # kpm_ref already holds the additive bias (1 - kpm) * -1e9.
            logits = logits + kpm_ref[0]

        out_ref[0] = logits.astype(out_ref.dtype)

    return kernel


def mha_weights_only(querys, keys, wq, wk, bk, num_heads,
                     attn_mask=None, key_padding_mask=None,
                     compute_dtype=jnp.bfloat16, out_dtype=jnp.float32):
    """Pallas implementation of MultiHeadAttentionWeightsOnly.forward.

    querys: (B, Lq, q_dim) or (Lq, q_dim); keys: (B, Lk, k_dim) or (Lk, k_dim)
    wq: (E, q_dim); wk: (E, k_dim); bk: (E,)
    attn_mask: optional (B, Lq, Lk) / (1, Lq, Lk) / (Lq, Lk)
    key_padding_mask: optional (B, Lk) (or (Lk,) unbatched)
    compute_dtype: streaming dtype for q/k/fused weights/mask (f32 accumulation).
    """
    is_batched = querys.ndim == 3
    if not is_batched:
        querys = querys[None]
        keys = keys[None]
        if key_padding_mask is not None and key_padding_mask.ndim == 1:
            key_padding_mask = key_padding_mask[None]

    B, Lq, Dq = querys.shape
    _, Lk, Dk = keys.shape
    E = wq.shape[0]
    head_dim = E // num_heads
    scale = 1.0 / (num_heads * math.sqrt(float(head_dim)))

    # Exact weight folding (tiny wrapper-side matmuls): removes E from the kernel.
    #   logits = q @ (scale * Wq^T Wk) @ k^T + q @ (scale * Wq^T bk)
    wqT = wq.astype(jnp.float32).T                                  # (Dq, E)
    m_fused = ((wqT @ wk.astype(jnp.float32)) * scale).astype(compute_dtype)
    v_fused = ((wqT @ bk.astype(jnp.float32)) * scale
               ).reshape(Dq, 1).astype(compute_dtype)

    # Pad sequence dims to the (8, 128) alignment; slice the output back at the
    # end.  Keeps lane-dense (unmasked) stores and bounded, pipelined tiles.
    Lq_pad = _round_up(Lq, 8)
    Lk_pad = _round_up(Lk, 128)
    q_in = querys.astype(compute_dtype)
    k_in = keys.astype(compute_dtype)
    if Lq_pad != Lq:
        q_in = jnp.pad(q_in, ((0, 0), (0, Lq_pad - Lq), (0, 0)))
    if Lk_pad != Lk:
        k_in = jnp.pad(k_in, ((0, 0), (0, Lk_pad - Lk), (0, 0)))

    tq = _pick_tile(Lq_pad, 256, 8)      # bigger LHS rows feed 2x256^2 MXU
    tk = _pick_tile(Lk_pad, 512, 128)    # lane-dense key / output tile
    grid = (B, Lq_pad // tq, Lk_pad // tk)

    has_kpm = key_padding_mask is not None
    has_attn = attn_mask is not None

    inputs = [q_in, k_in, m_fused, v_fused]
    in_specs = [
        pl.BlockSpec((1, tq, Dq), lambda b, qi, ki: (b, qi, 0)),     # querys
        pl.BlockSpec((1, tk, Dk), lambda b, qi, ki: (b, ki, 0)),     # keys
        # Grid-invariant fused weights (constant block index -> DMA'd once).
        pl.BlockSpec((Dq, Dk), lambda b, qi, ki: (0, 0)),            # fused M
        pl.BlockSpec((Dq, 1), lambda b, qi, ki: (0, 0)),             # fused bias
    ]

    if has_kpm:
        kpm = key_padding_mask.astype(jnp.float32).reshape(B, 1, Lk)
        if Lk_pad != Lk:
            kpm = jnp.pad(kpm, ((0, 0), (0, 0), (0, Lk_pad - Lk)),
                          constant_values=1.0)
        if not has_attn:
            # Fold into an additive bias -> single broadcast add in-kernel.
            kpm = (1.0 - kpm) * (-1.0e9)
        inputs.append(kpm)
        in_specs.append(pl.BlockSpec((1, 1, tk), lambda b, qi, ki: (b, 0, ki)))

    if has_attn:
        am = attn_mask
        if am.ndim == 2:
            am = am[None]                     # (1, Lq, Lk): shared across batch
        # 0/1 masks are exact in bf16; avoids the (B, Lq, Lk) broadcast in HBM.
        am = am.astype(compute_dtype)
        if Lq_pad != Lq or Lk_pad != Lk:
            am = jnp.pad(am, ((0, 0), (0, Lq_pad - Lq), (0, Lk_pad - Lk)),
                         constant_values=1.0)
        am_batched = am.shape[0] == B
        inputs.append(am)
        if am_batched:
            in_specs.append(
                pl.BlockSpec((1, tq, tk), lambda b, qi, ki: (b, qi, ki)))
        else:
            in_specs.append(
                pl.BlockSpec((1, tq, tk), lambda b, qi, ki: (0, qi, ki)))

    # Explicit VMEM budget (<= 64 MiB so the config also fits v7x).
    est = (2 * _buf_bytes(tq, Dq, compute_dtype)          # q (double-buffered)
           + 2 * _buf_bytes(tk, Dk, compute_dtype)        # k
           + 2 * _buf_bytes(Dq, Dk, compute_dtype)        # fused M
           + 2 * _buf_bytes(Dq, 1, compute_dtype)         # fused bias
           + 2 * _buf_bytes(tq, tk, out_dtype)            # output tile
           + _buf_bytes(tq, Dk, compute_dtype)            # qm scratch
           + _buf_bytes(tq, 1, jnp.float32))              # qv scratch
    if has_kpm:
        est += 2 * _buf_bytes(1, tk, jnp.float32)
    if has_attn:
        est += 2 * _buf_bytes(tq, tk, compute_dtype)
    vmem_limit = int(min(64 * 1024 * 1024, max(2 * est, 16 * 1024 * 1024)))

    out = pl.pallas_call(
        _make_kernel(has_kpm, has_attn),
        out_shape=jax.ShapeDtypeStruct((B, Lq_pad, Lk_pad), out_dtype),
        grid_spec=pltpu.PrefetchScalarGridSpec(
            num_scalar_prefetch=0,
            grid=grid,
            in_specs=in_specs,
            out_specs=pl.BlockSpec((1, tq, tk), lambda b, qi, ki: (b, qi, ki)),
            scratch_shapes=[pltpu.VMEM((tq, Dk), compute_dtype),   # hoisted q@M
                            pltpu.VMEM((tq, 1), jnp.float32)],     # hoisted q@v
        ),
        compiler_params=pltpu.CompilerParams(
            # ki must stay sequential (hoisted scratch); b/qi shard across cores.
            dimension_semantics=("parallel", "parallel", "arbitrary"),
            vmem_limit_bytes=vmem_limit),
    )(*inputs)

    out = out[:, :Lq, :Lk]
    if not is_batched:
        out = out[0]
    return out


def _reference(querys, keys, wq, wk, bk, num_heads,
               attn_mask=None, key_padding_mask=None):
    """Pure-JAX f32 reference mirroring the PyTorch forward exactly."""
    B, Lq, _ = querys.shape
    _, Lk, _ = keys.shape
    E = wq.shape[0]
    head_dim = E // num_heads
    Q = querys @ wq.T                              # (B, Lq, E)
    K = keys @ wk.T + bk                           # (B, Lk, E)
    Q = Q.reshape(B, Lq, num_heads, head_dim).transpose(0, 2, 1, 3)
    K = K.reshape(B, Lk, num_heads, head_dim).transpose(0, 2, 1, 3)
    logits = jnp.einsum("bhqd,bhkd->bhqk", Q, K) / head_dim ** 0.5
    logits = logits.mean(axis=1)
    mask = jnp.ones((B, Lq, Lk), jnp.float32)
    if key_padding_mask is not None:
        mask = mask * key_padding_mask[:, None, :].astype(jnp.float32)
    if attn_mask is not None:
        mask = mask * jnp.broadcast_to(attn_mask.astype(jnp.float32), (B, Lq, Lk))
    return logits + (1.0 - mask) * -1e9


if __name__ == "__main__":
    # Small shapes consistent with the module.
    B, Lq, Lk = 2, 8, 8
    q_dim, k_dim = 16, 16
    embed_dim, num_heads = 32, 4

    key = jax.random.PRNGKey(0)
    k1, k2, k3, k4, k5, k6 = jax.random.split(key, 6)

    querys = jax.random.normal(k1, (B, Lq, q_dim), jnp.float32)
    keys = jax.random.normal(k2, (B, Lk, k_dim), jnp.float32)

    # Deterministic parameter init (shapes per nn.Linear in __init__).
    wq = jax.random.normal(k3, (embed_dim, q_dim), jnp.float32) * (q_dim ** -0.5)
    wk = jax.random.normal(k4, (embed_dim, k_dim), jnp.float32) * (k_dim ** -0.5)
    bk = jax.random.normal(k5, (embed_dim,), jnp.float32) * 0.01

    key_padding_mask = (jax.random.uniform(k6, (B, Lk)) > 0.2).astype(jnp.float32)
    attn_mask = jnp.broadcast_to(jnp.tril(jnp.ones((Lq, Lk), jnp.float32)),
                                 (B, Lq, Lk))

    # bf16-streaming path (default): f32 accumulation, ~1e-3-level deltas.
    cases = [
        dict(attn_mask=attn_mask, key_padding_mask=key_padding_mask),
        dict(attn_mask=None, key_padding_mask=key_padding_mask),
        dict(attn_mask=None, key_padding_mask=None),
    ]
    for kwargs in cases:
        out = mha_weights_only(querys, keys, wq, wk, bk, num_heads, **kwargs)
        out = jax.block_until_ready(out)
        ref = _reference(querys, keys, wq, wk, bk, num_heads, **kwargs)
        assert out.shape == (B, Lq, Lk)
        assert jnp.allclose(out, ref, atol=2e-2, rtol=2e-2), "bf16 mismatch"

    # f32 compute path: exact structure check at tight tolerance.
    out_f32 = mha_weights_only(querys, keys, wq, wk, bk, num_heads,
                               attn_mask=attn_mask,
                               key_padding_mask=key_padding_mask,
                               compute_dtype=jnp.float32)
    out_f32 = jax.block_until_ready(out_f32)
    ref_f32 = _reference(querys, keys, wq, wk, bk, num_heads,
                         attn_mask=attn_mask, key_padding_mask=key_padding_mask)
    assert jnp.allclose(out_f32, ref_f32, atol=1e-3, rtol=1e-3), "f32 mismatch"

    # Unaligned (padded) shapes + 2D attn_mask shared across the batch.
    Lq2, Lk2 = 10, 9
    kq2, kk2, km2 = jax.random.split(jax.random.PRNGKey(1), 3)
    querys2 = jax.random.normal(kq2, (B, Lq2, q_dim), jnp.float32)
    keys2 = jax.random.normal(kk2, (B, Lk2, k_dim), jnp.float32)
    kpm2 = (jax.random.uniform(km2, (B, Lk2)) > 0.2).astype(jnp.float32)
    am2d = jnp.tril(jnp.ones((Lq2, Lk2), jnp.float32))
    out_p = mha_weights_only(querys2, keys2, wq, wk, bk, num_heads,
                             attn_mask=am2d, key_padding_mask=kpm2)
    out_p = jax.block_until_ready(out_p)
    ref_p = _reference(querys2, keys2, wq, wk, bk, num_heads,
                       attn_mask=am2d, key_padding_mask=kpm2)
    assert out_p.shape == (B, Lq2, Lk2)
    assert jnp.allclose(out_p, ref_p, atol=2e-2, rtol=2e-2), "padded mismatch"

    # Unbatched (2D) path.
    out2 = mha_weights_only(querys[0], keys[0], wq, wk, bk, num_heads)
    out2 = jax.block_until_ready(out2)
    ref2 = _reference(querys[:1], keys[:1], wq, wk, bk, num_heads)[0]
    assert out2.shape == (Lq, Lk)
    assert jnp.allclose(out2, ref2, atol=2e-2, rtol=2e-2), "unbatched mismatch"

    print("KERNEL_OK")
</pallas_src>

<mosaic_0001>
module attributes {stable_mosaic.version = 11 : i64} {
  func.func @kernel(%arg0: i32, %arg1: i32, %arg2: i32, %arg3: memref<1x8x16xbf16, #tpu.memory_space<vmem>>, %arg4: memref<1x128x16xbf16, #tpu.memory_space<vmem>>, %arg5: memref<16x16xbf16, #tpu.memory_space<vmem>>, %arg6: memref<16x1xbf16, #tpu.memory_space<vmem>>, %arg7: memref<1x1x128xf32, #tpu.memory_space<vmem>>, %arg8: memref<1x8x128xbf16, #tpu.memory_space<vmem>>, %arg9: memref<1x8x128xf32, #tpu.memory_space<vmem>>, %arg10: memref<8x16xbf16, #tpu.memory_space<vmem>>, %arg11: memref<8x1xf32, #tpu.memory_space<vmem>>) attributes {dimension_semantics = [#tpu.dimension_semantics<parallel>, #tpu.dimension_semantics<parallel>, #tpu.dimension_semantics<arbitrary>], iteration_bounds = array<i64: 2, 1, 1>, scalar_prefetch = 0 : i64, scratch_operands = 2 : i64, tpu.core_type = #tpu.core_type<tc>, window_params = [{transform_indices = @transform_0, window_bounds = array<i64: 1, 8, 16>}, {transform_indices = @transform_1, window_bounds = array<i64: 1, 128, 16>}, {pipeline_mode = #tpu.pipeline_mode<synchronous>, transform_indices = @transform_2, window_bounds = array<i64: 16, 16>}, {pipeline_mode = #tpu.pipeline_mode<synchronous>, transform_indices = @transform_3, window_bounds = array<i64: 16, 1>}, {transform_indices = @transform_4, window_bounds = array<i64: 1, 1, 128>}, {transform_indices = @transform_5, window_bounds = array<i64: 1, 8, 128>}, {transform_indices = @transform_6, window_bounds = array<i64: 1, 8, 128>}]} {
    %c0_i32 = arith.constant 0 : i32
    %0 = arith.cmpi eq, %arg2, %c0_i32 : i32
    %1 = arith.extui %0 : i1 to i32
    %c0_i32_0 = arith.constant 0 : i32
    %2 = arith.cmpi ne, %1, %c0_i32_0 : i32
    scf.if %2 {
      %c0_18 = arith.constant 0 : index
      %c0_19 = arith.constant 0 : index
      %c0_20 = arith.constant 0 : index
      %25 = vector.load %arg3[%c0_18, %c0_19, %c0_20] : memref<1x8x16xbf16, #tpu.memory_space<vmem>>, vector<1x8x16xbf16>
      %26 = vector.shape_cast %25 : vector<1x8x16xbf16> to vector<8x16xbf16>
      %c0_21 = arith.constant 0 : index
      %c0_22 = arith.constant 0 : index
      %27 = vector.load %arg5[%c0_21, %c0_22] : memref<16x16xbf16, #tpu.memory_space<vmem>>, vector<16x16xbf16>
      %cst_23 = arith.constant dense<0.000000e+00> : vector<8x16xf32>
      %28 = tpu.matmul %26, %27, %cst_23 {dimension_numbers = #tpu.dot_dimension_numbers<[1], [0], [0], [1], [0, 0, 1, 1], [], []>} : vector<8x16xbf16>, vector<16x16xbf16>, vector<8x16xf32> -> vector<8x16xf32>
      %29 = arith.truncf %28 : vector<8x16xf32> to vector<8x16xbf16>
      %c0_24 = arith.constant 0 : index
      %c0_25 = arith.constant 0 : index
      %30 = vector.load %arg10[%c0_24, %c0_25] : memref<8x16xbf16, #tpu.memory_space<vmem>>, vector<8x16xbf16>
      tpu.vector_store %arg10[%c0_24, %c0_25], %29 {strides = array<i32>} : memref<8x16xbf16, #tpu.memory_space<vmem>>, vector<8x16xbf16>,
      %c0_26 = arith.constant 0 : index
      %c0_27 = arith.constant 0 : index
      %31 = vector.load %arg6[%c0_26, %c0_27] : memref<16x1xbf16, #tpu.memory_space<vmem>>, vector<16x1xbf16>
      %cst_28 = arith.constant dense<0.000000e+00> : vector<8x1xf32>
      %32 = tpu.matmul %26, %31, %cst_28 {dimension_numbers = #tpu.dot_dimension_numbers<[1], [0], [0], [1], [0, 0, 1, 1], [], []>} : vector<8x16xbf16>, vector<16x1xbf16>, vector<8x1xf32> -> vector<8x1xf32>
      %c0_29 = arith.constant 0 : index
      %c0_30 = arith.constant 0 : index
      %33 = vector.load %arg11[%c0_29, %c0_30] : memref<8x1xf32, #tpu.memory_space<vmem>>, vector<8x1xf32>
      tpu.vector_store %arg11[%c0_29, %c0_30], %32 {strides = array<i32>} : memref<8x1xf32, #tpu.memory_space<vmem>>, vector<8x1xf32>,
    } else {
    }
    %c0 = arith.constant 0 : index
    %c0_1 = arith.constant 0 : index
    %c0_2 = arith.constant 0 : index
    %3 = vector.load %arg4[%c0, %c0_1, %c0_2] : memref<1x128x16xbf16, #tpu.memory_space<vmem>>, vector<1x128x16xbf16>
    %4 = vector.shape_cast %3 : vector<1x128x16xbf16> to vector<128x16xbf16>
    %c0_3 = arith.constant 0 : index
    %c0_4 = arith.constant 0 : index
    %5 = vector.load %arg10[%c0_3, %c0_4] : memref<8x16xbf16, #tpu.memory_space<vmem>>, vector<8x16xbf16>
    %cst = arith.constant dense<0.000000e+00> : vector<8x128xf32>
    %6 = tpu.matmul %5, %4, %cst {dimension_numbers = #tpu.dot_dimension_numbers<[1], [1], [0], [0], [0, 0, 1, 0], [], []>} : vector<8x16xbf16>, vector<128x16xbf16>, vector<8x128xf32> -> vector<8x128xf32>
    %c0_5 = arith.constant 0 : index
    %c0_6 = arith.constant 0 : index
    %7 = vector.load %arg11[%c0_5, %c0_6] : memref<8x1xf32, #tpu.memory_space<vmem>>, vector<8x1xf32>
    %8 = vector.broadcast %7 : vector<8x1xf32> to vector<8x128xf32>
    %9 = arith.addf %6, %8 : vector<8x128xf32>
    %c0_7 = arith.constant 0 : index
    %c0_8 = arith.constant 0 : index
    %c0_9 = arith.constant 0 : index
    %10 = vector.load %arg8[%c0_7, %c0_8, %c0_9] : memref<1x8x128xbf16, #tpu.memory_space<vmem>>, vector<1x8x128xbf16>
    %11 = vector.shape_cast %10 : vector<1x8x128xbf16> to vector<8x128xbf16>
    %12 = arith.extf %11 : vector<8x128xbf16> to vector<8x128xf32>
    %c0_10 = arith.constant 0 : index
    %c0_11 = arith.constant 0 : index
    %c0_12 = arith.constant 0 : index
    %13 = vector.load %arg7[%c0_10, %c0_11, %c0_12] : memref<1x1x128xf32, #tpu.memory_space<vmem>>, vector<1x1x128xf32>
    %14 = vector.shape_cast %13 : vector<1x1x128xf32> to vector<1x128xf32>
    %15 = vector.broadcast %14 : vector<1x128xf32> to vector<8x128xf32>
    %16 = arith.mulf %12, %15 : vector<8x128xf32>
    %cst_13 = arith.constant 1.000000e+00 : f32
    %17 = vector.broadcast %cst_13 : f32 to vector<8x128xf32>
    %18 = arith.subf %17, %16 : vector<8x128xf32>
    %cst_14 = arith.constant -1.000000e+09 : f32
    %19 = vector.broadcast %cst_14 : f32 to vector<8x128xf32>
    %20 = arith.mulf %18, %19 : vector<8x128xf32>
    %21 = arith.addf %9, %20 : vector<8x128xf32>
    %c0_15 = arith.constant 0 : index
    %c0_16 = arith.constant 0 : index
    %c0_17 = arith.constant 0 : index
    %22 = vector.load %arg9[%c0_15, %c0_16, %c0_17] : memref<1x8x128xf32, #tpu.memory_space<vmem>>, vector<1x8x128xf32>
    %23 = vector.shape_cast %22 : vector<1x8x128xf32> to vector<8x128xf32>
    %24 = vector.shape_cast %21 : vector<8x128xf32> to vector<1x8x128xf32>
    tpu.vector_store %arg9[%c0_15, %c0_16, %c0_17], %24 {strides = array<i32>} : memref<1x8x128xf32, #tpu.memory_space<vmem>>, vector<1x8x128xf32>,
    return
  }
  func.func @transform_0(%arg0: i32, %arg1: i32, %arg2: i32) -> (i32, i32, i32) {
    %c0_i32 = arith.constant 0 : i32
    %c0_i32_0 = arith.constant 0 : i32
    return %arg0, %arg1, %c0_i32 : i32, i32, i32
  }
  func.func @transform_1(%arg0: i32, %arg1: i32, %arg2: i32) -> (i32, i32, i32) {
    %c0_i32 = arith.constant 0 : i32
    %c0_i32_0 = arith.constant 0 : i32
    return %arg0, %arg2, %c0_i32 : i32, i32, i32
  }
  func.func @transform_2(%arg0: i32, %arg1: i32, %arg2: i32) -> (i32, i32) {
    %c0_i32 = arith.constant 0 : i32
    %c0_i32_0 = arith.constant 0 : i32
    %c0_i32_1 = arith.constant 0 : i32
    return %c0_i32, %c0_i32_0 : i32, i32
  }
  func.func @transform_3(%arg0: i32, %arg1: i32, %arg2: i32) -> (i32, i32) {
    %c0_i32 = arith.constant 0 : i32
    %c0_i32_0 = arith.constant 0 : i32
    %c0_i32_1 = arith.constant 0 : i32
    return %c0_i32, %c0_i32_0 : i32, i32
  }
  func.func @transform_4(%arg0: i32, %arg1: i32, %arg2: i32) -> (i32, i32, i32) {
    %c0_i32 = arith.constant 0 : i32
    %c0_i32_0 = arith.constant 0 : i32
    return %arg0, %c0_i32, %arg2 : i32, i32, i32
  }
  func.func @transform_5(%arg0: i32, %arg1: i32, %arg2: i32) -> (i32, i32, i32) {
    %c0_i32 = arith.constant 0 : i32
    return %arg0, %arg1, %arg2 : i32, i32, i32
  }
  func.func @transform_6(%arg0: i32, %arg1: i32, %arg2: i32) -> (i32, i32, i32) {
    %c0_i32 = arith.constant 0 : i32
    return %arg0, %arg1, %arg2 : i32, i32, i32
  }
}

</mosaic_0001>

<bundles_post_ra>
// kernel: tpu_custom_call.1
= control target key start
LH: loop header
LB: loop body
LE: loop exit
PB: predicated region body
PF: predicated region fallthrough
CT: control target
= control target key end

     0   :  { %11 = vsyncpa [#allocation5], 0  ;;  %s1195_s0 = inlined_call_operand.vmem [shape: bf16[2,8,16], index: 0, kind: input, shape index: {}]   ;;  %s1196_s1 = inlined_call_operand.vmem [shape: bf16[2,128,16], index: 1, kind: input, shape index: {}]   ;;  %s1197_s2 = inlined_call_operand.vmem [shape: bf16[16,16], index: 2, kind: input, shape index: {}]   ;;  %s1198_s3 = inlined_call_operand.vmem [shape: bf16[16,1], index: 3, kind: input, shape index: {}]   ;;  %s1199_s4 = inlined_call_operand.vmem [shape: f32[2,1,128], index: 4, kind: input, shape index: {}]   ;;  %s1200_s5 = inlined_call_operand.vmem [shape: bf16[2,8,128], index: 5, kind: input, shape index: {}]   ;;  %s1201_s6 = inlined_call_operand.hbm [shape: f32[2,8,128], index: 6, kind: output, shape index: {}]  }
   0x1   :  { %13 = vsyncpa [#allocation5 + $0x1], 0  ;;  %s1038_s21 = smov 0   ;;  %s1040_s22 = smov 0  }
   0x2   :  { %s1042_s23 = smov 0   ;;  %s1044_s24 = smov 0  }
   0x3   :  { %s1046_s25 = smov 0   ;;  %s1048_s26 = smov 0  }
   0x4 LB: > { %s776_s27 = sadd.s32 4294967295, %s997_s26   ;;  %s777_s28 = sadd.s32 4294967294, %s997_s26   ;;  %s997_s26 = sphi %s1048_s26, %s19_s26   ;;  %s993_s25 = sphi %s1046_s25, %s1208_s25   ;;  %s989_s24 = sphi %s1044_s24, %s1207_s24   ;;  %s985_s23 = sphi %s1042_s23, %s1206_s23   ;;  %s981_s22 = sphi %s1040_s22, %s1205_s22   ;;  %s977_s21 = sphi %s1038_s21, %s1204_s21  }
   0x5   : > { %s38_s29 = sadd.s32 1, %s993_s25  ;;  %s205_s30 = sadd.s32 1, %s985_s23 }
   0x6   : > { %p40_p0 = scmp.ge.s32.totalorder %s38_s29, 2  ;;  %p215_p1 = scmp.ne.s32.totalorder %s985_s23, %s981_s22 }
   0x7   : > { %p216_p2 = scmp.eq.s32.totalorder %s776_s27, 1  ;;  %p221_p3 = scmp.ne.s32.totalorder %s981_s22, %s977_s21 }
   0x8   : > { %s1210_s29 = smov (%p40_p0, %s38_s29), 0  ;;  %p222_p5 = scmp.eq.s32.totalorder %s777_s28, 1 }
   0x9   : > { %p1078_p4 = por %p216_p2, %p215_p1  ;;  %s198_s8 = ssub.s32 %s993_s25, %s1210_s29 }
   0xa   : > { %p780_p6 = scmp.ge.s32.totalorder %s997_s26, 1  ;;  %p203_p7 = scmp.eq.s32.totalorder %s198_s8, 0 }
   0xb   : > { %p1085_p8 = por %p222_p5, %p221_p3  ;;  %p291_p9 = scmp.lt.s32.totalorder %s997_s26, 3 }
   0xc   : > { %s1091_s10 = scalar_select %p203_p7, %s985_s23, %s205_s30  }
   0xd   : > { %p292_p10 = pnand %p780_p6, %p291_p9 }
   0xe   : > { %v909_v0 = vld [vmem:[%s1197_s2] sm:$0xff] (!%p292_p10)   ;;  %v999_v1 = vmov (!%p292_p10), 0.0   ;;  %p348_p11 = scmp.lt.s32.totalorder (!%p292_p10), %s989_s24, 1  ;;  %vm1000_vm0 = vmmov (!%p292_p10), 0   ;;  %vm395_vm1 = vcmask (!%p292_p10), 130048   ;;  %v1001_v20 = vmov (!%p292_p10), 0  }
   0xf   : > { %295 = sbr.rel (%p292_p10) target bundleno = 479 (0x1df), region = 44  ;;  %818 = vmatprep.subr.bf16.mxu1 (!%p292_p10), %v999_v1  ;;  %830 = vmatprep.subr.bf16.mxu0 (!%p292_p10), %v999_v1  ;;  %v910_v2 = vld [vmem:[%s1198_s3] sm:$0xff] (!%p292_p10)   ;;  %vm440_vm2 = vcmask (!%p292_p10), 125952   ;;  %vm490_vm3 = vcmask (!%p292_p10), 7168   ;;  %s345_s18 = sand.u32 (!%p292_p10), 1, %s981_s22  }
  0x10   : > { %819 = vmatpush3.bf16.msra.mxu1 (!%p292_p10), %v909_v0  ;;  %820 = vmatprep.mubr.msk.bf16.mxu1 (!%p292_p10), %vm1000_vm0, %v999_v1  ;;  %s781_s19 = sshll.u32 (!%p292_p10), %s345_s18, 3  ;;  %s638_s8 = scalar_lea.sflag (!%p292_p10), [#allocation5], %s345_s18 }
  0x11   : > { %824 = vmatprep.subr.bf16.mxu1 (!%p292_p10), %v999_v1  ;;  %846 = vmatprep.mubr.msk.bf16.mxu0 (!%p292_p10), %vm1000_vm0, %v999_v1  ;;  %s347_s27 = scalar_lea.vmem (!%p292_p10), [#allocation4], %s781_s19  ;;  %s1002_s11 = smov (!%p292_p10), [#allocation4]  }
  0x12   : > { %908 = vset.pattern.permute.xlu0 (!%p292_p10), %v1001_v20  ;;  %s653_s28 = sshll.u32 (!%p292_p10), %s347_s27, 4  ;;  %s1150_s28 = int_to_ptr.vmem [resolvable:$true] %s653_s28 }
  0x16   : > { %s1098_s13 = scalar_select %p348_p11, %s989_s24, 1 }
  0x18   : > { %s782_s14 = sshll.u32 %s1098_s13, 2  ;;  %s804_s15 = sshll.u32 %s1098_s13, 6 }
  0x19   : > { %s354_s20 = scalar_lea.vmem %s1195_s0, %s782_s14  ;;  %s1113_s30 = scalar_lea.vmem %s1196_s1, %s804_s15 }
  0x1a   : > { %v386_v3 = vld [vmem:[%s354_s20] sm:$0xf]  ;;  %v912_v6 = vld [vmem:[%s1113_s30 + $0x8] sm:$0xff]   ;;  %v913_v8 = vld [vmem:[%s1113_s30 + $0x10] sm:$0xff]   ;;  %s380_s12 = scalar_lea.vmem %s1200_s5, %s782_s14  ;;  %s370_s17 = scalar_lea.vmem %s1199_s4, %s1098_s13 }
  0x1b   : > { %821 = vmatmul.mubr.msk.bf16.vlgmr.msra.gmra.mrb[0].mxu1 %vm395_vm1, %v386_v3  ;;  %v911_v4 = vld [vmem:[%s1113_s30] sm:$0xff]   ;;  %v563_v7 = vsel %vm395_vm1, %v912_v6, 0  ;;  %v566_v9 = vsel %vm395_vm1, %v913_v8, 0  ;;  %v914_v10 = vld [vmem:[%s1113_s30 + $0x18] sm:$0xff]   ;;  %v916_v14 = vld [vmem:[%s1113_s30 + $0x28] sm:$0xff]   ;;  %s801_s20 = sshll.u32 %s989_s24, 7 }
  0x1c   : > { %825 = vmatpush3.bf16.msra.mxu1 %v910_v2  ;;  %826 = vmatprep.mubr.msk.bf16.mxu1 %vm1000_vm0, %v999_v1  ;;  %v560_v5 = vsel %vm395_vm1, %v911_v4, 0  ;;  %v569_v11 = vsel %vm395_vm1, %v914_v10, 0  ;;  %v915_v12 = vld [vmem:[%s1113_s30 + $0x20] sm:$0xff]   ;;  %v575_v15 = vsel %vm395_vm1, %v916_v14, 0  ;;  %v917_v16 = vld [vmem:[%s1113_s30 + $0x30] sm:$0xff]   ;;  %v918_v18 = vld [vmem:[%s1113_s30 + $0x38] sm:$0xff]   ;;  %s1148_s30 = scalar_lea.hbm %s1201_s6, %s801_s20 }
  0x1d   : > { %831 = vmatpush3.bf16.xpose.msra.mxu0 %v560_v5  ;;  %v572_v13 = vsel %vm395_vm1, %v915_v12, 0  ;;  %v578_v17 = vsel %vm395_vm1, %v917_v16, 0  ;;  %v581_v19 = vsel %vm395_vm1, %v918_v18, 0  ;;  %v623_v32 = vld [vmem:[%s380_s12] sm:$0xf]  ;;  %s919_s24 = scalar_lea.vmem %s1150_s28, 128 }
  0x1e   : > { %832 = vmatprep.subr.bf16.mxu0 %v999_v1  ;;  %v624_v33 = vunpack.c.l.bf16 %v623_v32  ;;  %v799_v34 = vld [vmem:[%s370_s17] ss:$0 sm:$0xff]  ;;  %p920_p12 = scmp.ne.s32.totalorder %s1150_s28, %s919_s24  ;;  %s923_s12 = sshll.u32 %s1002_s11, 4  ;;  %s924_s12 = int_to_ptr.vmem [resolvable:$false] %s923_s12 }
  0x1f   : > { %s925_s15 = scalar_lea.vmem %s924_s12, 256  ;;  %p926_p1 = scmp.lt.s32.totalorder %s1150_s28, %s924_s12 }
  0x20   : > { %v632_v35 = vmul.f32 %v799_v34, %v624_v33  ;;  %p921_p13 = pnand %p920_p12, %p1078_p4  ;;  %p927_p2 = scmp.lt.s32.totalorder %s925_s15, %s919_s24 }
  0x22   : > { %v633_v36 = vsub.f32 1.0, %v632_v35  ;;  %p922_p0 = pneg %p921_p13  ;;  %p928_p3 = por %p927_p2, %p926_p1 }
  0x23   : > { %827 = vmatmul.mubr.msk.bf16.vlgmr.msra.gmra.mrb[4].mxu1 %vm395_vm1, %v386_v3 }
  0x24   : > { %v634_v38 = vmul.f32 -1e+09, %v633_v36  ;;  %p929_p5 = pnand %p928_p3, %p922_p0 }
  0x25   : > { %833 = vmatpush3.bf16.xpose.msra.mxu0 %v563_v7 }
  0x26   : > { %834 = vmatprep.subr.bf16.mxu0 %v999_v1 }
  0x2d   : > { %835 = vmatpush3.bf16.xpose.msra.mxu0 %v566_v9 }
  0x2e   : > { %836 = vmatprep.subr.bf16.mxu0 %v999_v1 }
  0x35   : > { %837 = vmatpush3.bf16.xpose.msra.mxu0 %v569_v11 }
  0x36   : > { %838 = vmatprep.subr.bf16.mxu0 %v999_v1 }
  0x3d   : > { %839 = vmatpush3.bf16.xpose.msra.mxu0 %v572_v13 }
  0x3e   : > { %840 = vmatprep.subr.bf16.mxu0 %v999_v1 }
  0x45   : > { %841 = vmatpush3.bf16.xpose.msra.mxu0 %v575_v15 }
  0x46   : > { %842 = vmatprep.subr.bf16.mxu0 %v999_v1 }
  0x4d   : > { %843 = vmatpush3.bf16.xpose.msra.mxu0 %v578_v17 }
  0x4e   : > { %844 = vmatprep.subr.bf16.mxu0 %v999_v1 }
  0x55   : > { %845 = vmatpush3.bf16.xpose.msra.mxu0 %v581_v19 }
  0xee   : > { %v433_v21 = vpop.f32.mrb[0].mxu1 }
  0xef   : > { %v439_v22 = vpack.c.bf16 %v433_v21, %v433_v21  ;;  %v822_v23 = vpop.f32.mrb[1].mxu1 }
  0xf0   : > { %v436_v24 = vpop.f32.mrb[2].mxu1 }
  0xf1   : > { %441 = vst.msk [vmem:[#allocation2] sm:$0xf] %vm440_vm2, %v439_v22  ;;  %v823_v25 = vpop.f32.mrb[3].mxu1 }
  0xf6   : > { %v484_v26 = vpop.f32.mrb[4].mxu1 }
  0xf7   : > { %491 = vst.msk [vmem:[#allocation3] sm:$0xff] %vm490_vm3, %v484_v26  ;;  %v828_v27 = vpop.f32.mrb[5].mxu1 }
  0xf8   : > { %v508_v28 = vld [vmem:[#allocation2] sm:$0xf]  ;;  %v487_v29 = vpop.f32.mrb[6].mxu1 }
  0xf9   : > { %847 = vmatmul.mubr.msk.bf16.vlgmr.msra.gmra.mrb[0].mxu0 %vm395_vm1, %v508_v28  ;;  %v829_v30 = vpop.f32.mrb[7].mxu1 }
  0xfe   : > { %v509_v31 = vld [vmem:[#allocation3] sm:$0xff] }
  0xff   : > { %512 = vperm.xlu0 %908, %v509_v31  }
 0x17e   : > { %v513_v37 = vpop.permute.xlu0 %512 }
 0x1cc   : > { %v617_v39 = vpop.f32.mrb[0].mxu0 }
 0x1cd   : > { %v618_v40 = vadd.f32 %v617_v39, %v513_v37  ;;  %v848_v41 = vpop.f32.mrb[1].mxu0 }
 0x1ce   : > { %v620_v42 = vpop.f32.mrb[2].mxu0 }
 0x1cf   : > { %v635_v43 = vadd.f32 %v634_v38, %v618_v40  ;;  %v849_v44 = vpop.f32.mrb[3].mxu0 }
 0x1d1   : > { %636 = vst [vmem:[%s347_s27] sm:$0xff] %v635_v43 }
 0x1d2   : > { %932 = shalt.err (!%p929_p5)
}
 0x1d3   : > { %s933_s16 = scalar_lea.hbm %s1148_s30, 128  ;;  %s937_s19 = scalar_lea.hbm %s1201_s6, 256 }
 0x1d4   : > { %p934_p6 = scmp.ne.s32.totalorder %s1148_s30, %s933_s16  ;;  %p938_p10 = scmp.lt.u32.totalorder %s1148_s30, %s1201_s6 }
 0x1d5   : > { %p939_p11 = scmp.lt.u32.totalorder %s937_s19, %s933_s16  ;;  %p941_p13 = scmp.lt.u32.totalorder %s933_s16, %s1148_s30 }
 0x1d6   : > { %p935_p7 = pnand %p934_p6, %p1078_p4 }
 0x1d7   : > { %p940_p12 = por %p939_p11, %p938_p10 }
 0x1d8   : > { %p936_p9 = pneg %p935_p7 }
 0x1d9   : > { %p942_p0 = por %p941_p13, %p940_p12 }
 0x1db   : > { %p943_p1 = pnand %p942_p0, %p936_p9 }
 0x1dd   : > { %946 = shalt.err (!%p943_p1)
}
 0x1de   : > { %850 = dma.vmem_to_hbm [thread:$0]  (%p1078_p4), %s1150_s28, 128, %s1148_s30, %s638_s8  }
 0x1df PF: > { %p856_p2 = scmp.ge.s32.totalorder %s997_s26, 2  ;;  %s665_s14 = sand.u32 1, %s977_s21  }
 0x1e0   : > { %s666_s13 = scalar_lea.sflag [#allocation5], %s665_s14 }
 0x1e1   : > { %p853_p3 = pnand %p856_p2, %p1085_p8 }
 0x1e3   : > { %972 = dma.done.wait (!%p853_p3), %s666_s13, 128  }
 0x1e4   : > { %974 = vsyncadd (!%p853_p3), %s666_s13, 4294967168  ;;  %s19_s26 = sadd.s32 1, %s997_s26   ;;  %s1204_s21 = smov %s981_s22 }
 0x1e5   : > { %p16_p5 = scmp.ge.s32.totalorder %s19_s26, 4   ;;  %s1205_s22 = smov %s985_s23 }
 0x1e6   : > { %s1206_s23 = smov %s1091_s10  ;;  %s1207_s24 = smov %s993_s25 }
 0x1e7   : > { %s1208_s25 = smov %s1210_s29  ;;  %18 = sbr.rel (!%p16_p5) target bundleno = 4 (0x4), region = 92 }
 0x1ee   :  { %671 = vsyncpa [#allocation5], 1 }
 0x1ef   :  { %673 = vsyncpa [#allocation5 + $0x1], 1 }

</bundles_post_ra>
